<compile_context>
chip_gen: v7x
topology: tpu7x:2x2x1
jax: 0.10.0
libtpu: 0.0.40
codegen_flags: <defaults>
</compile_context>

<pallas_src>
import jax
import jax.numpy as jnp
from jax.experimental import pallas as pl
from jax.experimental.pallas import tpu as pltpu


def _round_up(x, m):
    return ((x + m - 1) // m) * m


def vae_kernel(x_ref, eps_ref,
               w1_ref, b1_ref, w23_ref, b23_ref,
               w4_ref, b4_ref, w5_ref, b5_ref,
               xhat_ref, mu_ref, logvar_ref):
    H = mu_ref.shape[-1]

    # encode: h = relu(fc1(x))
    x = x_ref[...].astype(jnp.bfloat16)
    h = jnp.dot(x, w1_ref[...], preferred_element_type=jnp.float32) + b1_ref[...]
    h = jnp.maximum(h, 0.0)

    # fused fc2|fc3: mu_logvar = h @ [w2|w3] + [b2|b3]   (one 2H-wide matmul)
    ml = (jnp.dot(h.astype(jnp.bfloat16), w23_ref[...],
                  preferred_element_type=jnp.float32) + b23_ref[...])
    mu = ml[:, :H]
    log_var = ml[:, H:]

    # reparameterization: z = mu + exp(0.5 * log_var) * eps   (f32 elementwise)
    sigma = jnp.exp(log_var * 0.5)
    z = mu + sigma * eps_ref[...].astype(jnp.float32)

    # decode: h2 = relu(fc4(z)); x_hat = sigmoid(fc5(h2))
    h2 = jnp.dot(z.astype(jnp.bfloat16), w4_ref[...],
                 preferred_element_type=jnp.float32) + b4_ref[...]
    h2 = jnp.maximum(h2, 0.0)
    logits = jnp.dot(h2.astype(jnp.bfloat16), w5_ref[...],
                     preferred_element_type=jnp.float32) + b5_ref[...]

    xhat_ref[...] = jax.nn.sigmoid(logits).astype(xhat_ref.dtype)
    mu_ref[...] = mu.astype(mu_ref.dtype)
    logvar_ref[...] = log_var.astype(logvar_ref.dtype)


def vae_forward(x_bsd, eps_bsh, params, row_tile=512):
    """x_bsd: [B, S, D] encoder hidden states; eps_bsh: [B, S, H] gaussian noise.

    Returns (x_hat [B,S,V], mu [B,S,H], log_var [B,S,H]) in float32.
    """
    B, S, D = x_bsd.shape
    H = eps_bsh.shape[-1]
    V = params["w5"].shape[1]
    M = B * S

    # Keep inputs in their native dtype (no wrapper up-cast); kernel casts
    # to bf16 for the MXU / f32 for elementwise as needed.
    x = x_bsd.reshape(M, D)
    eps = eps_bsh.reshape(M, H)

    # Row tile: large enough to hide per-step overhead, small enough that
    # (x + eps + 3 output tiles) * double-buffer + resident weights stays
    # well under the scoped VMEM limit on all generations (incl. v7x 64MiB).
    TM = min(row_tile, _round_up(M, 8))
    M_pad = _round_up(M, TM)
    if M_pad != M:
        x = jnp.pad(x, ((0, M_pad - M), (0, 0)))
        eps = jnp.pad(eps, ((0, M_pad - M), (0, 0)))
    num_tiles = M_pad // TM

    row_spec = lambda cols: pl.BlockSpec((TM, cols), lambda i: (i, 0))
    w_spec = lambda shape: pl.BlockSpec(shape, lambda i: (0, 0))  # resident

    in_specs = [
        row_spec(D),                       # x tile
        row_spec(H),                       # eps tile
        w_spec((D, D)), w_spec((1, D)),    # fc1
        w_spec((D, 2 * H)), w_spec((1, 2 * H)),  # fused fc2|fc3
        w_spec((H, D)), w_spec((1, D)),    # fc4
        w_spec((D, V)), w_spec((1, V)),    # fc5
    ]
    out_specs = (row_spec(V), row_spec(H), row_spec(H))
    out_shape = (
        jax.ShapeDtypeStruct((M_pad, V), jnp.float32),
        jax.ShapeDtypeStruct((M_pad, H), jnp.float32),
        jax.ShapeDtypeStruct((M_pad, H), jnp.float32),
    )

    x_hat, mu, log_var = pl.pallas_call(
        vae_kernel,
        grid=(num_tiles,),
        in_specs=in_specs,
        out_specs=out_specs,
        out_shape=out_shape,
        compiler_params=pltpu.CompilerParams(
            dimension_semantics=("parallel",),
            vmem_limit_bytes=32 << 20,
        ),
    )(
        x, eps,
        params["w1"], params["b1"],
        params["w23"], params["b23"],
        params["w4"], params["b4"],
        params["w5"], params["b5"],
    )

    return (x_hat[:M].reshape(B, S, V),
            mu[:M].reshape(B, S, H),
            log_var[:M].reshape(B, S, H))


def init_params(key, input_dim, h_dim, output_dim):
    """Deterministic nn.Linear-style init (uniform +-1/sqrt(fan_in)).

    Weights stored [in, out] in bf16 (MXU operands); biases kept f32
    (added post-accumulation). fc2/fc3 are packed into one [D, 2H] weight.
    """
    def linear(k, fan_in, fan_out):
        kw, kb = jax.random.split(k)
        bound = 1.0 / jnp.sqrt(float(fan_in))
        w = jax.random.uniform(kw, (fan_in, fan_out), jnp.float32, -bound, bound)
        b = jax.random.uniform(kb, (1, fan_out), jnp.float32, -bound, bound)
        return w, b

    keys = jax.random.split(key, 5)
    w1, b1 = linear(keys[0], input_dim, input_dim)
    w2, b2 = linear(keys[1], input_dim, h_dim)
    w3, b3 = linear(keys[2], input_dim, h_dim)
    w4, b4 = linear(keys[3], h_dim, input_dim)
    w5, b5 = linear(keys[4], input_dim, output_dim)

    w23 = jnp.concatenate([w2, w3], axis=1)   # [D, 2H]
    b23 = jnp.concatenate([b2, b3], axis=1)   # [1, 2H]

    bf = lambda w: w.astype(jnp.bfloat16)
    return dict(
        w1=bf(w1), b1=b1,
        w23=bf(w23), b23=b23,
        w4=bf(w4), b4=b4,
        w5=bf(w5), b5=b5,
    )


if __name__ == "__main__":
    # Small shapes consistent with the module's forward:
    #   input_dim (BERT hidden) -> 256, h_dim -> 128, vocab size -> 384
    B, S = 2, 8
    INPUT_DIM, H_DIM, VOCAB = 256, 128, 384

    root = jax.random.PRNGKey(0)
    k_params, k_x, k_eps = jax.random.split(root, 3)

    params = init_params(k_params, INPUT_DIM, H_DIM, VOCAB)

    # x plays the role of encoder(x)[0]: BERT last hidden states [B, S, D]
    x = jax.random.normal(k_x, (B, S, INPUT_DIM), jnp.float32)
    # eps ~ N(0, 1), same shape as (mu / sigma)
    eps = jax.random.normal(k_eps, (B, S, H_DIM), jnp.float32)

    x_hat, mu, log_var = vae_forward(x, eps, params)
    jax.block_until_ready((x_hat, mu, log_var))

    assert x_hat.shape == (B, S, VOCAB)
    assert mu.shape == (B, S, H_DIM)
    assert log_var.shape == (B, S, H_DIM)
    assert bool(jnp.all(jnp.isfinite(x_hat)))
    assert bool(jnp.all((x_hat >= 0.0) & (x_hat <= 1.0)))

    print("KERNEL_OK")
</pallas_src>

<mosaic_0001>
module attributes {stable_mosaic.version = 11 : i64} {
  func.func @vae_kernel(%arg0: i32, %arg1: memref<16x256xf32, #tpu.memory_space<vmem>>, %arg2: memref<16x128xf32, #tpu.memory_space<vmem>>, %arg3: memref<256x256xbf16, #tpu.memory_space<vmem>>, %arg4: memref<1x256xf32, #tpu.memory_space<vmem>>, %arg5: memref<256x256xbf16, #tpu.memory_space<vmem>>, %arg6: memref<1x256xf32, #tpu.memory_space<vmem>>, %arg7: memref<128x256xbf16, #tpu.memory_space<vmem>>, %arg8: memref<1x256xf32, #tpu.memory_space<vmem>>, %arg9: memref<256x384xbf16, #tpu.memory_space<vmem>>, %arg10: memref<1x384xf32, #tpu.memory_space<vmem>>, %arg11: memref<16x384xf32, #tpu.memory_space<vmem>>, %arg12: memref<16x128xf32, #tpu.memory_space<vmem>>, %arg13: memref<16x128xf32, #tpu.memory_space<vmem>>) attributes {dimension_semantics = [#tpu.dimension_semantics<parallel>], iteration_bounds = array<i64: 1>, scalar_prefetch = 0 : i64, scratch_operands = 0 : i64, tpu.core_type = #tpu.core_type<tc>, window_params = [{transform_indices = @transform_0, window_bounds = array<i64: 16, 256>}, {transform_indices = @transform_1, window_bounds = array<i64: 16, 128>}, {pipeline_mode = #tpu.pipeline_mode<synchronous>, transform_indices = @transform_2, window_bounds = array<i64: 256, 256>}, {pipeline_mode = #tpu.pipeline_mode<synchronous>, transform_indices = @transform_3, window_bounds = array<i64: 1, 256>}, {pipeline_mode = #tpu.pipeline_mode<synchronous>, transform_indices = @transform_4, window_bounds = array<i64: 256, 256>}, {pipeline_mode = #tpu.pipeline_mode<synchronous>, transform_indices = @transform_5, window_bounds = array<i64: 1, 256>}, {pipeline_mode = #tpu.pipeline_mode<synchronous>, transform_indices = @transform_6, window_bounds = array<i64: 128, 256>}, {pipeline_mode = #tpu.pipeline_mode<synchronous>, transform_indices = @transform_7, window_bounds = array<i64: 1, 256>}, {pipeline_mode = #tpu.pipeline_mode<synchronous>, transform_indices = @transform_8, window_bounds = array<i64: 256, 384>}, {pipeline_mode = #tpu.pipeline_mode<synchronous>, transform_indices = @transform_9, window_bounds = array<i64: 1, 384>}, {transform_indices = @transform_10, window_bounds = array<i64: 16, 384>}, {transform_indices = @transform_11, window_bounds = array<i64: 16, 128>}, {transform_indices = @transform_12, window_bounds = array<i64: 16, 128>}]} {
    %c0 = arith.constant 0 : index
    %c0_0 = arith.constant 0 : index
    %0 = vector.load %arg1[%c0, %c0_0] : memref<16x256xf32, #tpu.memory_space<vmem>>, vector<16x256xf32>
    %1 = arith.truncf %0 : vector<16x256xf32> to vector<16x256xbf16>
    %c0_1 = arith.constant 0 : index
    %c0_2 = arith.constant 0 : index
    %2 = vector.load %arg3[%c0_1, %c0_2] : memref<256x256xbf16, #tpu.memory_space<vmem>>, vector<256x256xbf16>
    %cst = arith.constant dense<0.000000e+00> : vector<16x256xf32>
    %3 = tpu.matmul %1, %2, %cst {dimension_numbers = #tpu.dot_dimension_numbers<[1], [0], [0], [1], [0, 0, 1, 1], [], []>} : vector<16x256xbf16>, vector<256x256xbf16>, vector<16x256xf32> -> vector<16x256xf32>
    %c0_3 = arith.constant 0 : index
    %c0_4 = arith.constant 0 : index
    %4 = vector.load %arg4[%c0_3, %c0_4] : memref<1x256xf32, #tpu.memory_space<vmem>>, vector<1x256xf32>
    %5 = vector.broadcast %4 : vector<1x256xf32> to vector<16x256xf32>
    %6 = arith.addf %3, %5 : vector<16x256xf32>
    %cst_5 = arith.constant 0.000000e+00 : f32
    %7 = vector.broadcast %cst_5 : f32 to vector<16x256xf32>
    %8 = arith.maximumf %6, %7 : vector<16x256xf32>
    %9 = arith.truncf %8 : vector<16x256xf32> to vector<16x256xbf16>
    %c0_6 = arith.constant 0 : index
    %c0_7 = arith.constant 0 : index
    %10 = vector.load %arg5[%c0_6, %c0_7] : memref<256x256xbf16, #tpu.memory_space<vmem>>, vector<256x256xbf16>
    %cst_8 = arith.constant dense<0.000000e+00> : vector<16x256xf32>
    %11 = tpu.matmul %9, %10, %cst_8 {dimension_numbers = #tpu.dot_dimension_numbers<[1], [0], [0], [1], [0, 0, 1, 1], [], []>} : vector<16x256xbf16>, vector<256x256xbf16>, vector<16x256xf32> -> vector<16x256xf32>
    %c0_9 = arith.constant 0 : index
    %c0_10 = arith.constant 0 : index
    %12 = vector.load %arg6[%c0_9, %c0_10] : memref<1x256xf32, #tpu.memory_space<vmem>>, vector<1x256xf32>
    %13 = vector.broadcast %12 : vector<1x256xf32> to vector<16x256xf32>
    %14 = arith.addf %11, %13 : vector<16x256xf32>
    %15 = vector.extract_strided_slice %14 {offsets = [0, 0], sizes = [16, 128], strides = [1, 1]} : vector<16x256xf32> to vector<16x128xf32>
    %16 = vector.extract_strided_slice %14 {offsets = [0, 128], sizes = [16, 128], strides = [1, 1]} : vector<16x256xf32> to vector<16x128xf32>
    %cst_11 = arith.constant 5.000000e-01 : f32
    %17 = vector.broadcast %cst_11 : f32 to vector<16x128xf32>
    %18 = arith.mulf %16, %17 : vector<16x128xf32>
    %19 = math.exp %18 : vector<16x128xf32>
    %c0_12 = arith.constant 0 : index
    %c0_13 = arith.constant 0 : index
    %20 = vector.load %arg2[%c0_12, %c0_13] : memref<16x128xf32, #tpu.memory_space<vmem>>, vector<16x128xf32>
    %21 = arith.mulf %19, %20 : vector<16x128xf32>
    %22 = arith.addf %15, %21 : vector<16x128xf32>
    %23 = arith.truncf %22 : vector<16x128xf32> to vector<16x128xbf16>
    %c0_14 = arith.constant 0 : index
    %c0_15 = arith.constant 0 : index
    %24 = vector.load %arg7[%c0_14, %c0_15] : memref<128x256xbf16, #tpu.memory_space<vmem>>, vector<128x256xbf16>
    %cst_16 = arith.constant dense<0.000000e+00> : vector<16x256xf32>
    %25 = tpu.matmul %23, %24, %cst_16 {dimension_numbers = #tpu.dot_dimension_numbers<[1], [0], [0], [1], [0, 0, 1, 1], [], []>} : vector<16x128xbf16>, vector<128x256xbf16>, vector<16x256xf32> -> vector<16x256xf32>
    %c0_17 = arith.constant 0 : index
    %c0_18 = arith.constant 0 : index
    %26 = vector.load %arg8[%c0_17, %c0_18] : memref<1x256xf32, #tpu.memory_space<vmem>>, vector<1x256xf32>
    %27 = vector.broadcast %26 : vector<1x256xf32> to vector<16x256xf32>
    %28 = arith.addf %25, %27 : vector<16x256xf32>
    %cst_19 = arith.constant 0.000000e+00 : f32
    %29 = vector.broadcast %cst_19 : f32 to vector<16x256xf32>
    %30 = arith.maximumf %28, %29 : vector<16x256xf32>
    %31 = arith.truncf %30 : vector<16x256xf32> to vector<16x256xbf16>
    %c0_20 = arith.constant 0 : index
    %c0_21 = arith.constant 0 : index
    %32 = vector.load %arg9[%c0_20, %c0_21] : memref<256x384xbf16, #tpu.memory_space<vmem>>, vector<256x384xbf16>
    %cst_22 = arith.constant dense<0.000000e+00> : vector<16x384xf32>
    %33 = tpu.matmul %31, %32, %cst_22 {dimension_numbers = #tpu.dot_dimension_numbers<[1], [0], [0], [1], [0, 0, 1, 1], [], []>} : vector<16x256xbf16>, vector<256x384xbf16>, vector<16x384xf32> -> vector<16x384xf32>
    %c0_23 = arith.constant 0 : index
    %c0_24 = arith.constant 0 : index
    %34 = vector.load %arg10[%c0_23, %c0_24] : memref<1x384xf32, #tpu.memory_space<vmem>>, vector<1x384xf32>
    %35 = vector.broadcast %34 : vector<1x384xf32> to vector<16x384xf32>
    %36 = arith.addf %33, %35 : vector<16x384xf32>
    %37 = arith.negf %36 : vector<16x384xf32>
    %38 = math.exp %37 : vector<16x384xf32>
    %cst_25 = arith.constant 1.000000e+00 : f32
    %39 = vector.broadcast %cst_25 : f32 to vector<16x384xf32>
    %40 = arith.addf %39, %38 : vector<16x384xf32>
    %41 = arith.divf %39, %40 : vector<16x384xf32>
    %c0_26 = arith.constant 0 : index
    %c0_27 = arith.constant 0 : index
    %42 = vector.load %arg11[%c0_26, %c0_27] : memref<16x384xf32, #tpu.memory_space<vmem>>, vector<16x384xf32>
    tpu.vector_store %arg11[%c0_26, %c0_27], %41 {strides = array<i32>} : memref<16x384xf32, #tpu.memory_space<vmem>>, vector<16x384xf32>,
    %c0_28 = arith.constant 0 : index
    %c0_29 = arith.constant 0 : index
    %43 = vector.load %arg12[%c0_28, %c0_29] : memref<16x128xf32, #tpu.memory_space<vmem>>, vector<16x128xf32>
    tpu.vector_store %arg12[%c0_28, %c0_29], %15 {strides = array<i32>} : memref<16x128xf32, #tpu.memory_space<vmem>>, vector<16x128xf32>,
    %c0_30 = arith.constant 0 : index
    %c0_31 = arith.constant 0 : index
    %44 = vector.load %arg13[%c0_30, %c0_31] : memref<16x128xf32, #tpu.memory_space<vmem>>, vector<16x128xf32>
    tpu.vector_store %arg13[%c0_30, %c0_31], %16 {strides = array<i32>} : memref<16x128xf32, #tpu.memory_space<vmem>>, vector<16x128xf32>,
    return
  }
  func.func @transform_0(%arg0: i32) -> (i32, i32) {
    %c0_i32 = arith.constant 0 : i32
    %c0_i32_0 = arith.constant 0 : i32
    return %arg0, %c0_i32 : i32, i32
  }
  func.func @transform_1(%arg0: i32) -> (i32, i32) {
    %c0_i32 = arith.constant 0 : i32
    %c0_i32_0 = arith.constant 0 : i32
    return %arg0, %c0_i32 : i32, i32
  }
  func.func @transform_2(%arg0: i32) -> (i32, i32) {
    %c0_i32 = arith.constant 0 : i32
    %c0_i32_0 = arith.constant 0 : i32
    %c0_i32_1 = arith.constant 0 : i32
    return %c0_i32, %c0_i32_0 : i32, i32
  }
  func.func @transform_3(%arg0: i32) -> (i32, i32) {
    %c0_i32 = arith.constant 0 : i32
    %c0_i32_0 = arith.constant 0 : i32
    %c0_i32_1 = arith.constant 0 : i32
    return %c0_i32, %c0_i32_0 : i32, i32
  }
  func.func @transform_4(%arg0: i32) -> (i32, i32) {
    %c0_i32 = arith.constant 0 : i32
    %c0_i32_0 = arith.constant 0 : i32
    %c0_i32_1 = arith.constant 0 : i32
    return %c0_i32, %c0_i32_0 : i32, i32
  }
  func.func @transform_5(%arg0: i32) -> (i32, i32) {
    %c0_i32 = arith.constant 0 : i32
    %c0_i32_0 = arith.constant 0 : i32
    %c0_i32_1 = arith.constant 0 : i32
    return %c0_i32, %c0_i32_0 : i32, i32
  }
  func.func @transform_6(%arg0: i32) -> (i32, i32) {
    %c0_i32 = arith.constant 0 : i32
    %c0_i32_0 = arith.constant 0 : i32
    %c0_i32_1 = arith.constant 0 : i32
    return %c0_i32, %c0_i32_0 : i32, i32
  }
  func.func @transform_7(%arg0: i32) -> (i32, i32) {
    %c0_i32 = arith.constant 0 : i32
    %c0_i32_0 = arith.constant 0 : i32
    %c0_i32_1 = arith.constant 0 : i32
    return %c0_i32, %c0_i32_0 : i32, i32
  }
  func.func @transform_8(%arg0: i32) -> (i32, i32) {
    %c0_i32 = arith.constant 0 : i32
    %c0_i32_0 = arith.constant 0 : i32
    %c0_i32_1 = arith.constant 0 : i32
    return %c0_i32, %c0_i32_0 : i32, i32
  }
  func.func @transform_9(%arg0: i32) -> (i32, i32) {
    %c0_i32 = arith.constant 0 : i32
    %c0_i32_0 = arith.constant 0 : i32
    %c0_i32_1 = arith.constant 0 : i32
    return %c0_i32, %c0_i32_0 : i32, i32
  }
  func.func @transform_10(%arg0: i32) -> (i32, i32) {
    %c0_i32 = arith.constant 0 : i32
    %c0_i32_0 = arith.constant 0 : i32
    return %arg0, %c0_i32 : i32, i32
  }
  func.func @transform_11(%arg0: i32) -> (i32, i32) {
    %c0_i32 = arith.constant 0 : i32
    %c0_i32_0 = arith.constant 0 : i32
    return %arg0, %c0_i32 : i32, i32
  }
  func.func @transform_12(%arg0: i32) -> (i32, i32) {
    %c0_i32 = arith.constant 0 : i32
    %c0_i32_0 = arith.constant 0 : i32
    return %arg0, %c0_i32 : i32, i32
  }
}

</mosaic_0001>

<bundles_post_ra>
// kernel: tpu_custom_call.1
= control target key start
LH: loop header
LB: loop body
LE: loop exit
PB: predicated region body
PF: predicated region fallthrough
CT: control target
= control target key end

     0   :  { %18 = vsyncpa [#allocation3], 0  ;;  %s2151_s0 = inlined_call_operand.hbm [shape: f32[16,256], index: 0, kind: input, shape index: {}]   ;;  %s2152_s1 = inlined_call_operand.hbm [shape: f32[16,128], index: 1, kind: input, shape index: {}]   ;;  %s2153_s2 = inlined_call_operand.hbm [shape: bf16[256,256], index: 2, kind: input, shape index: {}]   ;;  %s2154_s3 = inlined_call_operand.vmem [shape: f32[1,256], index: 3, kind: input, shape index: {}]   ;;  %s2155_s4 = inlined_call_operand.hbm [shape: bf16[256,256], index: 4, kind: input, shape index: {}]   ;;  %s2156_s5 = inlined_call_operand.vmem [shape: f32[1,256], index: 5, kind: input, shape index: {}]   ;;  %s2157_s6 = inlined_call_operand.hbm [shape: bf16[128,256], index: 6, kind: input, shape index: {}]   ;;  %s2158_s7 = inlined_call_operand.vmem [shape: f32[1,256], index: 7, kind: input, shape index: {}]   ;;  %s2159_s8 = inlined_call_operand.hbm [shape: bf16[256,384], index: 8, kind: input, shape index: {}]   ;;  %s2160_s9 = inlined_call_operand.vmem [shape: f32[1,384], index: 9, kind: input, shape index: {}]   ;;  %s2161_s10 = inlined_call_operand.hbm [shape: f32[16,384], index: 10, kind: output, shape index: {0}]   ;;  %s2162_s11 = inlined_call_operand.hbm [shape: f32[16,128], index: 11, kind: output, shape index: {1}]   ;;  %s2163_s12 = inlined_call_operand.hbm [shape: f32[16,128], index: 12, kind: output, shape index: {2}]  }
   0x1   :  { %19 = vsyncpa [#allocation6], 0 }
   0x2   :  { %20 = vsyncpa [#allocation9], 0 }
   0x3   :  { %21 = vsyncpa [#allocation12], 0 }
   0x4   :  { %22 = vsyncpa [#allocation4], 0 }
   0x5   :  { %23 = vsyncpa [#allocation15], 0  ;;  %s1913_s21 = smov [#allocation5]   ;;  %s1703_s25 = scalar_lea.hbm %s2152_s1, 256 }
   0x6   :  { %s41_s22 = sshll.u32 %s1913_s21, 4  ;;  %p1704_p0 = scmp.ne.s32.totalorder %s2152_s1, %s1703_s25  ;;  %s42_s22 = int_to_ptr.vmem [resolvable:$true] %s41_s22 }
   0x7   :  { %p1707_p1 = scmp.lt.u32.totalorder %s1703_s25, %s2152_s1 }
   0x9   :  { %p1709_p2 = pnand %p1707_p1, %p1704_p0 }
   0xb   :  { %1712 = shalt.err (!%p1709_p2)
}
   0xc   :  { %s1713_s30 = scalar_lea.vmem %s42_s22, 256  ;;  %p1718_p4 = scmp.lt.s32.totalorder %s42_s22, %s42_s22 }
   0xd   :  { %p1714_p3 = scmp.ne.s32.totalorder %s42_s22, %s1713_s30  ;;  %p1719_p5 = scmp.lt.s32.totalorder %s1713_s30, %s1713_s30 }
   0xf   :  { %p1720_p6 = por %p1719_p5, %p1718_p4 }
  0x11   :  { %p1721_p7 = pnand %p1720_p6, %p1714_p3 }
  0x13   :  { %1724 = shalt.err (!%p1721_p7)
}
  0x14   :  { %s1914_s13 = smov 128   ;;  %s1915_s14 = smov 8  }
  0x15   :  { %47 = dma.hbm_to_vmem [thread:$0]  %s2152_s1, 256, %s42_s22, [#allocation6], %s1914_s13, %s1914_s13, %s1915_s14  }
  0x16   :  { %s1916_s17 = smov [#allocation8]   ;;  %s1917_s19 = smov [#allocation2]  }
  0x17   :  { %s67_s18 = sshll.u32 %s1916_s17, 4  ;;  %s29_s20 = sshll.u32 %s1917_s19, 4  ;;  %s68_s18 = int_to_ptr.vmem [resolvable:$true] %s67_s18  ;;  %s30_s20 = int_to_ptr.vmem [resolvable:$true] %s29_s20 }
  0x18   :  { %s1725_s24 = scalar_lea.hbm %s2155_s4, 4096 }
  0x19   :  { %p1726_p8 = scmp.ne.s32.totalorder %s2155_s4, %s1725_s24  ;;  %p1729_p9 = scmp.lt.u32.totalorder %s1725_s24, %s2155_s4 }
  0x1b   :  { %p1731_p10 = pnand %p1729_p9, %p1726_p8 }
  0x1d   :  { %1734 = shalt.err (!%p1731_p10)
}
  0x1e   :  { %s1735_s1 = scalar_lea.vmem %s68_s18, 4096  ;;  %p1740_p12 = scmp.lt.s32.totalorder %s68_s18, %s68_s18 }
  0x1f   :  { %p1736_p11 = scmp.ne.s32.totalorder %s68_s18, %s1735_s1  ;;  %p1741_p13 = scmp.lt.s32.totalorder %s1735_s1, %s1735_s1 }
  0x21   :  { %p1742_p0 = por %p1741_p13, %p1740_p12 }
  0x23   :  { %p1743_p1 = pnand %p1742_p0, %p1736_p11 }
  0x25   :  { %1746 = shalt.err (!%p1743_p1)
}
  0x26   :  { %73 = dma.hbm_to_vmem [thread:$0]  %s2155_s4, 4096, %s68_s18, [#allocation9], %s1914_s13, %s1914_s13, %s1915_s14  }
  0x27   :  { %s1747_s16 = scalar_lea.hbm %s2151_s0, 512 }
  0x28   :  { %p1748_p2 = scmp.ne.s32.totalorder %s2151_s0, %s1747_s16  ;;  %p1751_p3 = scmp.lt.u32.totalorder %s1747_s16, %s2151_s0 }
  0x2a   :  { %p1753_p4 = pnand %p1751_p3, %p1748_p2 }
  0x2c   :  { %1756 = shalt.err (!%p1753_p4)
}
  0x2d   :  { %s1757_s24 = scalar_lea.vmem %s30_s20, 512  ;;  %p1762_p6 = scmp.lt.s32.totalorder %s30_s20, %s30_s20 }
  0x2e   :  { %p1758_p5 = scmp.ne.s32.totalorder %s30_s20, %s1757_s24  ;;  %p1763_p7 = scmp.lt.s32.totalorder %s1757_s24, %s1757_s24 }
  0x30   :  { %p1764_p8 = por %p1763_p7, %p1762_p6 }
  0x32   :  { %p1765_p9 = pnand %p1764_p8, %p1758_p5 }
  0x34   :  { %1768 = shalt.err (!%p1765_p9)
}
  0x35   :  { %s1918_s4 = smov 256   ;;  %s1919_s18 = smov 16  }
  0x36   :  { %35 = dma.hbm_to_vmem [thread:$0]  %s2151_s0, 512, %s30_s20, [#allocation3], %s1918_s4, %s1918_s4, %s1919_s18  }
  0x37   :  { %s1920_s27 = smov [#allocation7]   ;;  %s1921_s1 = smov [#allocation10]  }
  0x38   :  { %s53_s28 = sshll.u32 %s1920_s27, 4  ;;  %s81_s22 = sshll.u32 %s1921_s1, 4  ;;  %s54_s28 = int_to_ptr.vmem [resolvable:$true] %s53_s28  ;;  %s82_s22 = int_to_ptr.vmem [resolvable:$true] %s81_s22 }
  0x39   :  { %s1769_s15 = scalar_lea.hbm %s2153_s2, 4096 }
  0x3a   :  { %p1770_p10 = scmp.ne.s32.totalorder %s2153_s2, %s1769_s15  ;;  %p1773_p11 = scmp.lt.u32.totalorder %s1769_s15, %s2153_s2 }
  0x3c   :  { %p1775_p12 = pnand %p1773_p11, %p1770_p10 }
  0x3e   :  { %1778 = shalt.err (!%p1775_p12)
}
  0x3f   :  { %s1779_s0 = scalar_lea.vmem %s54_s28, 4096  ;;  %p1784_p0 = scmp.lt.s32.totalorder %s54_s28, %s54_s28 }
  0x40   :  { %p1780_p13 = scmp.ne.s32.totalorder %s54_s28, %s1779_s0  ;;  %p1785_p1 = scmp.lt.s32.totalorder %s1779_s0, %s1779_s0 }
  0x42   :  { %p1786_p2 = por %p1785_p1, %p1784_p0 }
  0x44   :  { %p1787_p3 = pnand %p1786_p2, %p1780_p13 }
  0x46   :  { %1790 = shalt.err (!%p1787_p3)
}
  0x47   :  { %59 = dma.hbm_to_vmem [thread:$0]  %s2153_s2, 4096, %s54_s28, [#allocation6], %s1914_s13, %s1914_s13, %s1915_s14  }
  0x48   :  { %s1791_s18 = scalar_lea.hbm %s2157_s6, 2048 }
  0x49   :  { %p1792_p4 = scmp.ne.s32.totalorder %s2157_s6, %s1791_s18  ;;  %p1795_p5 = scmp.lt.u32.totalorder %s1791_s18, %s2157_s6 }
  0x4b   :  { %p1797_p6 = pnand %p1795_p5, %p1792_p4 }
  0x4d   :  { %1800 = shalt.err (!%p1797_p6)
}
  0x4e   :  { %s1801_s29 = scalar_lea.vmem %s82_s22, 2048  ;;  %p1806_p8 = scmp.lt.s32.totalorder %s82_s22, %s82_s22 }
  0x4f   :  { %p1802_p7 = scmp.ne.s32.totalorder %s82_s22, %s1801_s29  ;;  %p1807_p9 = scmp.lt.s32.totalorder %s1801_s29, %s1801_s29 }
  0x51   :  { %p1808_p10 = por %p1807_p9, %p1806_p8 }
  0x53   :  { %p1809_p11 = pnand %p1808_p10, %p1802_p7 }
  0x55   :  { %1812 = shalt.err (!%p1809_p11)
}
  0x56   :  { %87 = dma.hbm_to_vmem [thread:$0]  %s2157_s6, 2048, %s82_s22, [#allocation9], %s1914_s13, %s1914_s13, %s1915_s14  }
  0x57   :  { %s1922_s30 = smov [#allocation11]   ;;  %s1813_s19 = scalar_lea.hbm %s2159_s8, 6144 }
  0x58   :  { %s95_s15 = sshll.u32 %s1922_s30, 4  ;;  %p1814_p12 = scmp.ne.s32.totalorder %s2159_s8, %s1813_s19  ;;  %s96_s15 = int_to_ptr.vmem [resolvable:$true] %s95_s15 }
  0x59   :  { %p1817_p13 = scmp.lt.u32.totalorder %s1813_s19, %s2159_s8 }
  0x5b   :  { %p1819_p0 = pnand %p1817_p13, %p1814_p12 }
  0x5d   :  { %1822 = shalt.err (!%p1819_p0)
}
  0x5e   :  { %s1823_s24 = scalar_lea.vmem %s96_s15, 6144  ;;  %p1828_p2 = scmp.lt.s32.totalorder %s96_s15, %s96_s15 }
  0x5f   :  { %p1824_p1 = scmp.ne.s32.totalorder %s96_s15, %s1823_s24  ;;  %p1829_p3 = scmp.lt.s32.totalorder %s1823_s24, %s1823_s24 }
  0x61   :  { %p1830_p4 = por %p1829_p3, %p1828_p2 }
  0x63   :  { %p1831_p5 = pnand %p1830_p4, %p1824_p1 }
  0x65   :  { %1834 = shalt.err (!%p1831_p5)
}
  0x66   :  { %s1923_s6 = smov 192   ;;  %s1924_s22 = smov 12  }
  0x67   :  { %101 = dma.hbm_to_vmem [thread:$0]  %s2159_s8, 6144, %s96_s15, [#allocation12], %s1923_s6, %s1923_s6, %s1924_s22  }
  0x68   :  { %1901 = dma.done.wait [#allocation3], 512  }
  0x69   :  { %1902 = vsyncadd [#allocation3], 4294966784 }
  0x6a   :  { %1903 = dma.done.wait [#allocation6], 4352  }
  0x6b   :  { %1904 = vsyncadd [#allocation6], 4294962944 }
  0x6c   :  { %1905 = dma.done.wait [#allocation9], 6144  }
  0x6d   :  { %1906 = vsyncadd [#allocation9], 4294961152 }
  0x6e   :  { %1907 = dma.done.wait [#allocation12], 6144  }
  0x6f   :  { %1908 = vsyncadd [#allocation12], 4294961152  ;;  %v1491_v0 = vld [vmem:[#allocation7 + $0x4] ss:$8 sps:$4 sm:$0xff]   ;;  %v1493_v1 = vld [vmem:[#allocation7] ss:$8 sps:$4 sm:$0xff]  }
  0x70   :  { %333 = vmatprep.subr.bf16.mxu0 %v1491_v0  ;;  %v1494_v2 = vld [vmem:[#allocation7 + $0x14] ss:$8 sps:$4 sm:$0xff]   ;;  %v1496_v3 = vld [vmem:[#allocation7 + $0x10] ss:$8 sps:$4 sm:$0xff]   ;;  %v1497_v4 = vld [vmem:[#allocation7 + $0x24] ss:$8 sps:$4 sm:$0xff]  }
  0x71   :  { %334 = vmatpush1.bf16.msra.mxu0 %v1493_v1  ;;  %v1499_v5 = vld [vmem:[#allocation7 + $0x20] ss:$8 sps:$4 sm:$0xff]   ;;  %v1500_v6 = vld [vmem:[#allocation7 + $0x34] ss:$8 sps:$4 sm:$0xff]   ;;  %v1502_v7 = vld [vmem:[#allocation7 + $0x30] ss:$8 sps:$4 sm:$0xff]  }
  0x72   :  { %335 = vmatprep.subr.bf16.mxu0 %v1494_v2  ;;  %v1503_v8 = vld [vmem:[#allocation7 + $0x44] ss:$8 sps:$4 sm:$0xff]   ;;  %v1505_v9 = vld [vmem:[#allocation7 + $0x40] ss:$8 sps:$4 sm:$0xff]   ;;  %v1506_v10 = vld [vmem:[#allocation7 + $0x54] ss:$8 sps:$4 sm:$0xff]  }
  0x73   :  { %v1508_v11 = vld [vmem:[#allocation7 + $0x50] ss:$8 sps:$4 sm:$0xff]   ;;  %v1509_v12 = vld [vmem:[#allocation7 + $0x64] ss:$8 sps:$4 sm:$0xff]   ;;  %v1511_v15 = vld [vmem:[#allocation7 + $0x60] ss:$8 sps:$4 sm:$0xff]  }
  0x74   :  { %v124_v13 = vld [vmem:[#allocation2 + $0x8] sm:$0xff]  ;;  %v126_v14 = vld [vmem:[#allocation2 + $0x18] sm:$0xff]  ;;  %v123_v55 = vld [vmem:[#allocation2] sm:$0xff] }
  0x75   :  { %336 = vmatpush1.bf16.msra.mxu0 %v1496_v3  ;;  %v1512_v16 = vld [vmem:[#allocation7 + $0x74] ss:$8 sps:$4 sm:$0xff]   ;;  %v128_v17 = vpack.c.bf16 %v126_v14, %v124_v13  ;;  %v1539_v18 = vld [vmem:[#allocation8 + $0x4] ss:$8 sps:$4 sm:$0xff]   ;;  %v1541_v19 = vld [vmem:[#allocation8] ss:$8 sps:$4 sm:$0xff]  }
  0x76   :  { %337 = vmatprep.subr.bf16.mxu0 %v1497_v4  ;;  %v1542_v20 = vld [vmem:[#allocation8 + $0x14] ss:$8 sps:$4 sm:$0xff]   ;;  %586 = vmatprep.subr.bf16.mxu1 %v1539_v18  ;;  %v1544_v21 = vld [vmem:[#allocation8 + $0x10] ss:$8 sps:$4 sm:$0xff]   ;;  %v1545_v23 = vld [vmem:[#allocation8 + $0x24] ss:$8 sps:$4 sm:$0xff]  }
  0x77   :  { %365 = vmatprep.mubr.bf16.mxu0 %v128_v17  ;;  %587 = vmatpush1.bf16.msra.mxu1 %v1541_v19  ;;  %v1514_v22 = vld [vmem:[#allocation7 + $0x70] ss:$8 sps:$4 sm:$0xff]   ;;  %v1515_v24 = vld [vmem:[#allocation7 + $0x84] ss:$8 sps:$4 sm:$0xff]   ;;  %v1547_v25 = vld [vmem:[#allocation8 + $0x20] ss:$8 sps:$4 sm:$0xff]  }
  0x78   :  { %588 = vmatprep.subr.bf16.mxu1 %v1542_v20  ;;  %v1517_v26 = vld [vmem:[#allocation7 + $0x80] ss:$8 sps:$4 sm:$0xff]   ;;  %v1548_v27 = vld [vmem:[#allocation8 + $0x34] ss:$8 sps:$4 sm:$0xff]   ;;  %v1550_v29 = vld [vmem:[#allocation8 + $0x30] ss:$8 sps:$4 sm:$0xff]  }
  0x79   :  { %338 = vmatpush1.bf16.msra.mxu0 %v1499_v5  ;;  %v1518_v28 = vld [vmem:[#allocation7 + $0x94] ss:$8 sps:$4 sm:$0xff]   ;;  %v1520_v30 = vld [vmem:[#allocation7 + $0x90] ss:$8 sps:$4 sm:$0xff]   ;;  %v1551_v31 = vld [vmem:[#allocation8 + $0x44] ss:$8 sps:$4 sm:$0xff]  }
  0x7a   :  { %339 = vmatprep.subr.bf16.mxu0 %v1500_v6  ;;  %v1521_v32 = vld [vmem:[#allocation7 + $0xa4] ss:$8 sps:$4 sm:$0xff]   ;;  %v1523_v33 = vld [vmem:[#allocation7 + $0xa0] ss:$8 sps:$4 sm:$0xff]   ;;  %v1524_v35 = vld [vmem:[#allocation7 + $0xb4] ss:$8 sps:$4 sm:$0xff]  }
  0x7b   :  { %589 = vmatpush1.bf16.msra.mxu1 %v1544_v21  ;;  %v1553_v34 = vld [vmem:[#allocation8 + $0x40] ss:$8 sps:$4 sm:$0xff]   ;;  %v1554_v36 = vld [vmem:[#allocation8 + $0x54] ss:$8 sps:$4 sm:$0xff]   ;;  %v1556_v37 = vld [vmem:[#allocation8 + $0x50] ss:$8 sps:$4 sm:$0xff]  }
  0x7c   :  { %590 = vmatprep.subr.bf16.mxu1 %v1545_v23  ;;  %v1526_v38 = vld [vmem:[#allocation7 + $0xb0] ss:$8 sps:$4 sm:$0xff]   ;;  %v1557_v39 = vld [vmem:[#allocation8 + $0x64] ss:$8 sps:$4 sm:$0xff]   ;;  %v1559_v41 = vld [vmem:[#allocation8 + $0x60] ss:$8 sps:$4 sm:$0xff]  }
  0x7d   :  { %340 = vmatpush1.bf16.msra.mxu0 %v1502_v7  ;;  %v1527_v40 = vld [vmem:[#allocation7 + $0xc4] ss:$8 sps:$4 sm:$0xff]   ;;  %v1529_v42 = vld [vmem:[#allocation7 + $0xc0] ss:$8 sps:$4 sm:$0xff]   ;;  %v1560_v43 = vld [vmem:[#allocation8 + $0x74] ss:$8 sps:$4 sm:$0xff]  }
  0x7e   :  { %341 = vmatprep.subr.bf16.mxu0 %v1503_v8  ;;  %v1530_v44 = vld [vmem:[#allocation7 + $0xd4] ss:$8 sps:$4 sm:$0xff]   ;;  %v1562_v45 = vld [vmem:[#allocation8 + $0x70] ss:$8 sps:$4 sm:$0xff]   ;;  %v1563_v47 = vld [vmem:[#allocation8 + $0x84] ss:$8 sps:$4 sm:$0xff]  }
  0x7f   :  { %591 = vmatpush1.bf16.msra.mxu1 %v1547_v25  ;;  %v1532_v46 = vld [vmem:[#allocation7 + $0xd0] ss:$8 sps:$4 sm:$0xff]   ;;  %v1533_v48 = vld [vmem:[#allocation7 + $0xe4] ss:$8 sps:$4 sm:$0xff]   ;;  %v1565_v49 = vld [vmem:[#allocation8 + $0x80] ss:$8 sps:$4 sm:$0xff]  }
  0x80   :  { %592 = vmatprep.subr.bf16.mxu1 %v1548_v27  ;;  %v1535_v50 = vld [vmem:[#allocation7 + $0xe0] ss:$8 sps:$4 sm:$0xff]   ;;  %v1566_v51 = vld [vmem:[#allocation8 + $0x94] ss:$8 sps:$4 sm:$0xff]   ;;  %v1568_v53 = vld [vmem:[#allocation8 + $0x90] ss:$8 sps:$4 sm:$0xff]  }
  0x81   :  { %342 = vmatpush1.bf16.msra.mxu0 %v1505_v9  ;;  %v1536_v52 = vld [vmem:[#allocation7 + $0xf4] ss:$8 sps:$4 sm:$0xff]   ;;  %v1538_v54 = vld [vmem:[#allocation7 + $0xf0] ss:$8 sps:$4 sm:$0xff]   ;;  %v125_v56 = vld [vmem:[#allocation2 + $0x10] sm:$0xff] }
  0x82   :  { %343 = vmatprep.subr.bf16.mxu0 %v1506_v10  ;;  %v1569_v57 = vld [vmem:[#allocation8 + $0xa4] ss:$8 sps:$4 sm:$0xff]   ;;  %v1571_v58 = vld [vmem:[#allocation8 + $0xa0] ss:$8 sps:$4 sm:$0xff]   ;;  %v1572_v59 = vld [vmem:[#allocation8 + $0xb4] ss:$8 sps:$4 sm:$0xff]   ;;  %v127_v60 = vpack.c.bf16 %v125_v56, %v123_v55  ;;  %v163_v10 = vlaneseq }
  0x83   :  { %593 = vmatpush1.bf16.msra.mxu1 %v1550_v29  ;;  %v1574_v61 = vld [vmem:[#allocation8 + $0xb0] ss:$8 sps:$4 sm:$0xff]   ;;  %v1575_v62 = vld [vmem:[#allocation8 + $0xc4] ss:$8 sps:$4 sm:$0xff]   ;;  %v1577_v63 = vld [vmem:[#allocation8 + $0xc0] ss:$8 sps:$4 sm:$0xff]  }
  0x84   :  { %594 = vmatprep.subr.bf16.mxu1 %v1551_v31  ;;  %v1578_v0 = vld [vmem:[#allocation8 + $0xd4] ss:$8 sps:$4 sm:$0xff]   ;;  %v1580_v1 = vld [vmem:[#allocation8 + $0xd0] ss:$8 sps:$4 sm:$0xff]   ;;  %v1581_v2 = vld [vmem:[#allocation8 + $0xe4] ss:$8 sps:$4 sm:$0xff]  }
  0x85   :  { %344 = vmatpush1.bf16.msra.mxu0 %v1508_v11  ;;  %v1583_v3 = vld [vmem:[#allocation8 + $0xe0] ss:$8 sps:$4 sm:$0xff]   ;;  %v1584_v4 = vld [vmem:[#allocation8 + $0xf4] ss:$8 sps:$4 sm:$0xff]   ;;  %v1586_v5 = vld [vmem:[#allocation8 + $0xf0] ss:$8 sps:$4 sm:$0xff]  }
  0x86   :  { %345 = vmatprep.subr.bf16.mxu0 %v1509_v12  ;;  %v1587_v6 = vld [vmem:[#allocation10] ss:$8 sps:$4 sm:$0xff]   ;;  %v1589_v7 = vld [vmem:[#allocation10 + $0x4] ss:$8 sps:$4 sm:$0xff]   ;;  %v1592_v8 = vld [vmem:[#allocation10 + $0x14] ss:$8 sps:$4 sm:$0xff]  }
  0x87   :  { %595 = vmatpush1.bf16.msra.mxu1 %v1553_v34  ;;  %v1590_v9 = vld [vmem:[#allocation10 + $0x10] ss:$8 sps:$4 sm:$0xff]   ;;  %v2080_v11 = vshrl.u32 %v163_v10, 7  ;;  %v1595_v31 = vld [vmem:[#allocation10 + $0x24] ss:$8 sps:$4 sm:$0xff]  }
  0x88   :  { %596 = vmatprep.subr.bf16.mxu1 %v1554_v36  ;;  %v161_v13 = vld [vmem:[%s2154_s3] sm:$0x3]  ;;  %v1599_v36 = vld [vmem:[#allocation10 + $0x40] ss:$8 sps:$4 sm:$0xff]   ;;  %v1626_v56 = vld [vmem:[#allocation11 + $0x78] ss:$12 sps:$4 sm:$0xff]  }
  0x89   :  { %346 = vmatpush1.bf16.msra.mxu0 %v1511_v15  ;;  %v2083_v12 = vsub.s32 0, %v2080_v11  ;;  %v2089_v14 = vsub.s32 1, %v2080_v11  ;;  %v1596_v34 = vld [vmem:[#allocation10 + $0x30] ss:$8 sps:$4 sm:$0xff]   ;;  %v1628_v55 = vld [vmem:[#allocation11 + $0x7c] ss:$12 sps:$4 sm:$0xff]  }
  0x8a   :  { %347 = vmatprep.subr.bf16.mxu0 %v1512_v16 }
  0x8b   :  { %597 = vmatpush1.bf16.msra.mxu1 %v1556_v37  ;;  %v166_v15 = vrot.slane %v161_v13, %v2083_v12  ;;  %v170_v16 = vrot.slane %v161_v13, %v2089_v14  ;;  %v1604_v37 = vld [vmem:[#allocation10 + $0x54] ss:$8 sps:$4 sm:$0xff]  }
  0x8c   :  { %598 = vmatprep.subr.bf16.mxu1 %v1557_v39  ;;  %v1607_v39 = vld [vmem:[#allocation10 + $0x64] ss:$8 sps:$4 sm:$0xff]  }
  0x8d   :  { %348 = vmatpush1.bf16.msra.mxu0 %v1514_v22 }
  0x8e   :  { %349 = vmatprep.subr.bf16.mxu0 %v1515_v24 }
  0x8f   :  { %599 = vmatpush1.bf16.msra.mxu1 %v1559_v41  ;;  %v1605_v41 = vld [vmem:[#allocation10 + $0x60] ss:$8 sps:$4 sm:$0xff]  }
  0x90   :  { %600 = vmatprep.subr.bf16.mxu1 %v1560_v43  ;;  %v1608_v43 = vld [vmem:[#allocation10 + $0x70] ss:$8 sps:$4 sm:$0xff]  }
  0x91   :  { %350 = vmatpush1.bf16.msra.mxu0 %v1517_v26 }
  0x92   :  { %351 = vmatprep.subr.bf16.mxu0 %v1518_v28 }
  0x93   :  { %601 = vmatpush1.bf16.msra.mxu1 %v1562_v45  ;;  %v1613_v45 = vld [vmem:[#allocation11 + $0x4] ss:$12 sps:$4 sm:$0xff]  }
  0x94   :  { %602 = vmatprep.subr.bf16.mxu1 %v1563_v47  ;;  %v1614_v47 = vld [vmem:[#allocation11 + $0x18] ss:$12 sps:$4 sm:$0xff]  }
  0x95   :  { %352 = vmatpush1.bf16.msra.mxu0 %v1520_v30 }
  0x96   :  { %353 = vmatprep.subr.bf16.mxu0 %v1521_v32  ;;  %v1593_v32 = vld [vmem:[#allocation10 + $0x20] ss:$8 sps:$4 sm:$0xff]  }
  0x97   :  { %603 = vmatpush1.bf16.msra.mxu1 %v1565_v49  ;;  %v1638_v49 = vld [vmem:[#allocation11 + $0xc8] ss:$12 sps:$4 sm:$0xff]  }
  0x98   :  { %604 = vmatprep.subr.bf16.mxu1 %v1566_v51  ;;  %v1622_v51 = vld [vmem:[#allocation11 + $0x4c] ss:$12 sps:$4 sm:$0xff]  }
  0x99   :  { %354 = vmatpush1.bf16.msra.mxu0 %v1523_v33  ;;  %v1598_v33 = vld [vmem:[#allocation10 + $0x34] ss:$8 sps:$4 sm:$0xff]  }
  0x9a   :  { %355 = vmatprep.subr.bf16.mxu0 %v1524_v35  ;;  %v1601_v35 = vld [vmem:[#allocation10 + $0x44] ss:$8 sps:$4 sm:$0xff]  }
  0x9b   :  { %605 = vmatpush1.bf16.msra.mxu1 %v1568_v53  ;;  %v1625_v53 = vld [vmem:[#allocation11 + $0x64] ss:$12 sps:$4 sm:$0xff]  }
  0x9c   :  { %606 = vmatprep.subr.bf16.mxu1 %v1569_v57  ;;  %v1631_v57 = vld [vmem:[#allocation11 + $0x94] ss:$12 sps:$4 sm:$0xff]  }
  0x9d   :  { %356 = vmatpush1.bf16.msra.mxu0 %v1526_v38  ;;  %v1602_v38 = vld [vmem:[#allocation10 + $0x50] ss:$8 sps:$4 sm:$0xff]  }
  0x9e   :  { %357 = vmatprep.subr.bf16.mxu0 %v1527_v40  ;;  %v1925_v40 = vmov 0  }
  0x9f   :  { %607 = vmatpush1.bf16.msra.mxu1 %v1571_v58  ;;  %v1629_v58 = vld [vmem:[#allocation11 + $0x90] ss:$12 sps:$4 sm:$0xff]  }
  0xa0   :  { %608 = vmatprep.subr.bf16.mxu1 %v1572_v59  ;;  %v1634_v59 = vld [vmem:[#allocation11 + $0xac] ss:$12 sps:$4 sm:$0xff]  }
  0xa1   :  { %358 = vmatpush1.bf16.msra.mxu0 %v1529_v42  ;;  %v1610_v42 = vld [vmem:[#allocation10 + $0x74] ss:$8 sps:$4 sm:$0xff]  }
  0xa2   :  { %359 = vmatprep.subr.bf16.mxu0 %v1530_v44  ;;  %v1611_v44 = vld [vmem:[#allocation11] ss:$12 sps:$4 sm:$0xff]  }
  0xa3   :  { %609 = vmatpush1.bf16.msra.mxu1 %v1574_v61  ;;  %v1637_v61 = vld [vmem:[#allocation11 + $0xc4] ss:$12 sps:$4 sm:$0xff]  }
  0xa4   :  { %610 = vmatprep.subr.bf16.mxu1 %v1575_v62  ;;  %v1635_v62 = vld [vmem:[#allocation11 + $0xc0] ss:$12 sps:$4 sm:$0xff]  }
  0xa5   :  { %360 = vmatpush1.bf16.msra.mxu0 %v1532_v46  ;;  %v1616_v46 = vld [vmem:[#allocation11 + $0x1c] ss:$12 sps:$4 sm:$0xff]  }
  0xa6   :  { %361 = vmatprep.subr.bf16.mxu0 %v1533_v48  ;;  %v1619_v48 = vld [vmem:[#allocation11 + $0x34] ss:$12 sps:$4 sm:$0xff]  }
  0xa7   :  { %611 = vmatpush1.bf16.msra.mxu1 %v1577_v63  ;;  %v1642_v63 = vld [vmem:[#allocation11 + $0xdc] ss:$12 sps:$4 sm:$0xff]  }
  0xa8   :  { %612 = vmatprep.subr.bf16.mxu1 %v1578_v0  ;;  %v1640_v0 = vld [vmem:[#allocation11 + $0xd8] ss:$12 sps:$4 sm:$0xff]  }
  0xa9   :  { %362 = vmatpush1.bf16.msra.mxu0 %v1535_v50  ;;  %v1617_v50 = vld [vmem:[#allocation11 + $0x30] ss:$12 sps:$4 sm:$0xff]  }
  0xaa   :  { %363 = vmatprep.subr.bf16.mxu0 %v1536_v52  ;;  %v1620_v52 = vld [vmem:[#allocation11 + $0x48] ss:$12 sps:$4 sm:$0xff]  }
  0xab   :  { %613 = vmatpush1.bf16.msra.mxu1 %v1580_v1  ;;  %v1647_v1 = vld [vmem:[#allocation11 + $0xf4] ss:$12 sps:$4 sm:$0xff]  }
  0xac   :  { %614 = vmatprep.subr.bf16.mxu1 %v1581_v2  ;;  %v1645_v2 = vld [vmem:[#allocation11 + $0xf0] ss:$12 sps:$4 sm:$0xff]  }
  0xad   :  { %364 = vmatpush1.bf16.msra.mxu0 %v1538_v54  ;;  %v1623_v54 = vld [vmem:[#allocation11 + $0x60] ss:$12 sps:$4 sm:$0xff]  }
  0xae   :  { %750 = vmatprep.subr.bf16.mxu0 %v1589_v7  ;;  %v1662_v7 = vld [vmem:[#allocation11 + $0x13c] ss:$12 sps:$4 sm:$0xff]  }
  0xaf   :  { %615 = vmatpush1.bf16.msra.mxu1 %v1583_v3  ;;  %v1652_v3 = vld [vmem:[#allocation11 + $0x10c] ss:$12 sps:$4 sm:$0xff]  }
  0xb0   :  { %366 = vmatmul.mubr.bf16.vlgmr.msra.gmra.mrb[0].mxu0 %v127_v60  ;;  %616 = vmatprep.subr.bf16.mxu1 %v1584_v4  ;;  %v1632_v60 = vld [vmem:[#allocation11 + $0xa8] ss:$12 sps:$4 sm:$0xff]  }
  0xb1   :  { %751 = vmatpush1.bf16.msra.mxu0 %v1587_v6  ;;  %782 = vmatprep.mubr.bf16.mxu0 %v1925_v40  ;;  %v1650_v4 = vld [vmem:[#allocation11 + $0x108] ss:$12 sps:$4 sm:$0xff]   ;;  %v1655_v6 = vld [vmem:[#allocation11 + $0x120] ss:$12 sps:$4 sm:$0xff]   ;;  %v1649_v40 = vld [vmem:[#allocation11 + $0x38] ss:$12 sps:$4 sm:$0xff]  }
  0xb2   :  { %752 = vmatprep.subr.bf16.mxu0 %v1592_v8  ;;  %v1660_v8 = vld [vmem:[#allocation11 + $0x138] ss:$12 sps:$4 sm:$0xff]  }
  0xb3   :  { %617 = vmatpush1.bf16.msra.mxu1 %v1586_v5  ;;  %v1657_v5 = vld [vmem:[#allocation11 + $0x124] ss:$12 sps:$4 sm:$0xff]  }
  0xb4   :  { %1136 = vmatprep.subr.bf16.mxu1 %v1613_v45  ;;  %v1663_v45 = vld [vmem:[#allocation11 + $0x140] ss:$12 sps:$4 sm:$0xff]  }
  0xb5   :  { %753 = vmatpush1.bf16.msra.mxu0 %v1590_v9  ;;  %v414_v9 = vld [vmem:[%s2156_s5] sm:$0x3] }
  0xb6   :  { %754 = vmatprep.subr.bf16.mxu0 %v1595_v31  ;;  %v419_v10 = vrot.slane %v414_v9, %v2083_v12  ;;  %v423_v13 = vrot.slane %v414_v9, %v2089_v14 }
  0xb9   :  { %755 = vmatpush1.bf16.msra.mxu0 %v1593_v32 }
  0xba   :  { %756 = vmatprep.subr.bf16.mxu0 %v1598_v33 }
  0xbd   :  { %757 = vmatpush1.bf16.msra.mxu0 %v1596_v34 }
  0xbe   :  { %758 = vmatprep.subr.bf16.mxu0 %v1601_v35  ;;  %v1639_v35 = vld [vmem:[#allocation11 + $0x8] ss:$12 sps:$4 sm:$0xff]  }
  0xc1   :  { %759 = vmatpush1.bf16.msra.mxu0 %v1599_v36 }
  0xc2   :  { %760 = vmatprep.subr.bf16.mxu0 %v1604_v37  ;;  %v1643_v37 = vld [vmem:[#allocation11 + $0xe0] ss:$12 sps:$4 sm:$0xff]  }
  0xc5   :  { %761 = vmatpush1.bf16.msra.mxu0 %v1602_v38  ;;  %v1644_v38 = vld [vmem:[#allocation11 + $0x20] ss:$12 sps:$4 sm:$0xff]  }
  0xc6   :  { %762 = vmatprep.subr.bf16.mxu0 %v1607_v39  ;;  %v1648_v39 = vld [vmem:[#allocation11 + $0xf8] ss:$12 sps:$4 sm:$0xff]  }
  0xc9   :  { %763 = vmatpush1.bf16.msra.mxu0 %v1605_v41  ;;  %v1653_v41 = vld [vmem:[#allocation11 + $0x110] ss:$12 sps:$4 sm:$0xff]  }
  0xca   :  { %764 = vmatprep.subr.bf16.mxu0 %v1610_v42  ;;  %v1654_v42 = vld [vmem:[#allocation11 + $0x50] ss:$12 sps:$4 sm:$0xff]  }
  0xcd   :  { %765 = vmatpush1.bf16.msra.mxu0 %v1608_v43  ;;  %v1658_v43 = vld [vmem:[#allocation11 + $0x128] ss:$12 sps:$4 sm:$0xff]  }
  0xce   :  { %1451 = vmatprep.subr.bf16.mxu0 %v1638_v49  ;;  %v1665_v49 = vld [vmem:[#allocation11 + $0x150] ss:$12 sps:$4 sm:$0xff]  }
 0x183   :  { %v367_v17 = vpop.f32.mrb[0].mxu0 }
 0x184   :  { %v368_v18 = vadd.f32 %v367_v17, %v166_v15  ;;  %v369_v19 = vpop.f32.mrb[1].mxu0 }
 0x185   :  { %v370_v20 = vadd.f32 %v369_v19, %v170_v16  ;;  %v371_v21 = vpop.f32.mrb[2].mxu0 }
 0x186   :  { %v372_v22 = vadd.f32 %v371_v21, %v166_v15  ;;  %v373_v23 = vpop.f32.mrb[3].mxu0  ;;  %v376_v25 = vmax.f32 %v368_v18, 0.0 }
 0x187   :  { %v374_v24 = vadd.f32 %v373_v23, %v170_v16  ;;  %v377_v27 = vmax.f32 %v370_v20, 0.0 }
 0x188   :  { %v378_v26 = vmax.f32 %v372_v22, 0.0 }
 0x189   :  { %v379_v28 = vmax.f32 %v374_v24, 0.0 }
 0x18a   :  { %v380_v29 = vpack.c.bf16 %v378_v26, %v376_v25 }
 0x18b   :  { %v381_v30 = vpack.c.bf16 %v379_v28, %v377_v27  ;;  %v635_v27 = vld [vmem:[#allocation5] sm:$0xff] }
 0x18d   :  { %618 = vmatprep.mubr.bf16.mxu1 %v381_v30 }
 0x18e   :  { %619 = vmatmul.mubr.bf16.vlgmr.msra.gmra.mrb[0].mxu1 %v380_v29  ;;  %v636_v29 = vld [vmem:[#allocation5 + $0x8] sm:$0xff] }
 0x18f   :  { %1137 = vmatpush1.bf16.msra.mxu1 %v1611_v44  ;;  %v1659_v44 = vld [vmem:[#allocation11 + $0x68] ss:$12 sps:$4 sm:$0xff]  }
 0x190   :  { %1138 = vmatprep.subr.bf16.mxu1 %v1616_v46  ;;  %v1664_v46 = vld [vmem:[#allocation11 + $0x80] ss:$12 sps:$4 sm:$0xff]  }
 0x193   :  { %1139 = vmatpush1.bf16.msra.mxu1 %v1614_v47  ;;  %v1667_v47 = vld [vmem:[#allocation11 + $0x154] ss:$12 sps:$4 sm:$0xff]  }
 0x194   :  { %1140 = vmatprep.subr.bf16.mxu1 %v1619_v48  ;;  %v1668_v48 = vld [vmem:[#allocation11 + $0x158] ss:$12 sps:$4 sm:$0xff]  }
 0x197   :  { %1141 = vmatpush1.bf16.msra.mxu1 %v1617_v50  ;;  %v1669_v50 = vld [vmem:[#allocation11 + $0x98] ss:$12 sps:$4 sm:$0xff]  }
 0x198   :  { %1142 = vmatprep.subr.bf16.mxu1 %v1622_v51  ;;  %v1672_v51 = vld [vmem:[#allocation11 + $0x16c] ss:$12 sps:$4 sm:$0xff]  }
 0x19b   :  { %1143 = vmatpush1.bf16.msra.mxu1 %v1620_v52  ;;  %v1673_v52 = vld [vmem:[#allocation11 + $0x170] ss:$12 sps:$4 sm:$0xff]  }
 0x19c   :  { %1144 = vmatprep.subr.bf16.mxu1 %v1625_v53  ;;  %v1670_v53 = vld [vmem:[#allocation11 + $0x168] ss:$12 sps:$4 sm:$0xff]  }
 0x19f   :  { %1145 = vmatpush1.bf16.msra.mxu1 %v1623_v54  ;;  %v1674_v54 = vld [vmem:[#allocation11 + $0xb0] ss:$12 sps:$4 sm:$0xff]  }
 0x1a0   :  { %1146 = vmatprep.subr.bf16.mxu1 %v1628_v55  ;;  %v658_v55 = vld [vmem:[%s2158_s7] sm:$0x3]  ;;  %s1926_s7 = smov [#allocation14]  }
 0x1a1   :  { %s1283_s1 = sshll.u32 %s1926_s7, 4  ;;  %s1284_s1 = int_to_ptr.vmem [resolvable:$true] %s1283_s1 }
 0x1a2   :  { %s1835_s29 = scalar_lea.vmem %s1284_s1, 256  ;;  %p1840_p7 = scmp.lt.s32.totalorder %s1284_s1, %s1284_s1 }
 0x1a3   :  { %1147 = vmatpush1.bf16.msra.mxu1 %v1626_v56  ;;  %v663_v56 = vrot.slane %v658_v55, %v2083_v12  ;;  %p1836_p6 = scmp.ne.s32.totalorder %s1284_s1, %s1835_s29  ;;  %p1841_p8 = scmp.lt.s32.totalorder %s1835_s29, %s1835_s29 }
 0x1a4   :  { %1148 = vmatprep.subr.bf16.mxu1 %v1631_v57  ;;  %v667_v57 = vrot.slane %v658_v55, %v2089_v14 }
 0x1a5   :  { %p1842_p9 = por %p1841_p8, %p1840_p7 }
 0x1a7   :  { %1149 = vmatpush1.bf16.msra.mxu1 %v1629_v58  ;;  %p1843_p10 = pnand %p1842_p9, %p1836_p6 }
 0x1a8   :  { %1150 = vmatprep.subr.bf16.mxu1 %v1634_v59 }
 0x1ab   :  { %1151 = vmatpush1.bf16.msra.mxu1 %v1632_v60 }
 0x1ac   :  { %1152 = vmatprep.subr.bf16.mxu1 %v1637_v61 }
 0x1af   :  { %1153 = vmatpush1.bf16.msra.mxu1 %v1635_v62 }
 0x1b0   :  { %1154 = vmatprep.subr.bf16.mxu1 %v1642_v63 }
 0x1b3   :  { %1155 = vmatpush1.bf16.msra.mxu1 %v1640_v0 }
 0x1b4   :  { %1156 = vmatprep.subr.bf16.mxu1 %v1647_v1 }
 0x1b7   :  { %1157 = vmatpush1.bf16.msra.mxu1 %v1645_v2 }
 0x1b8   :  { %1158 = vmatprep.subr.bf16.mxu1 %v1652_v3 }
 0x1bb   :  { %1159 = vmatpush1.bf16.msra.mxu1 %v1650_v4 }
 0x1bc   :  { %1160 = vmatprep.subr.bf16.mxu1 %v1657_v5 }
 0x1bf   :  { %1161 = vmatpush1.bf16.msra.mxu1 %v1655_v6 }
 0x1c0   :  { %1162 = vmatprep.subr.bf16.mxu1 %v1662_v7 }
 0x1c3   :  { %1163 = vmatpush1.bf16.msra.mxu1 %v1660_v8 }
 0x1c4   :  { %1164 = vmatprep.subr.bf16.mxu1 %v1667_v47 }
 0x1c7   :  { %1165 = vmatpush1.bf16.msra.mxu1 %v1665_v49 }
 0x1c8   :  { %1166 = vmatprep.subr.bf16.mxu1 %v1672_v51 }
 0x1cb   :  { %1167 = vmatpush1.bf16.msra.mxu1 %v1670_v53 }
 0x261   :  { %v620_v15 = vpop.f32.mrb[0].mxu1 }
 0x262   :  { %v621_v16 = vadd.f32 %v620_v15, %v419_v10  ;;  %v622_v17 = vpop.f32.mrb[1].mxu1 }
 0x263   :  { %v623_v18 = vadd.f32 %v622_v17, %v423_v13  ;;  %v624_v19 = vpop.f32.mrb[2].mxu1 }
 0x264   :  { %1262 = vst [vmem:[#allocation14] sm:$0xff] %v621_v16  ;;  %v625_v20 = vadd.f32 %v624_v19, %v419_v10  ;;  %v626_v21 = vpop.f32.mrb[3].mxu1 }
 0x265   :  { %v629_v22 = vmul.f32 0.5, %v623_v18  ;;  %1264 = vst [vmem:[#allocation16] sm:$0xff] %v623_v18  ;;  %v627_v23 = vadd.f32 %v626_v21, %v423_v13 }
 0x266   :  { %1263 = vst [vmem:[#allocation14 + $0x8] sm:$0xff] %v625_v20 }
 0x267   :  { %v631_v24 = vmul.f32 1.442695, %v629_v22  ;;  %v630_v25 = vmul.f32 0.5, %v627_v23  ;;  %1265 = vst [vmem:[#allocation16 + $0x8] sm:$0xff] %v627_v23 }
 0x269   :  { %1675 = vpow2.f32 %v631_v24  ;;  %v633_v26 = vmul.f32 1.442695, %v630_v25 }
 0x26b   :  { %1677 = vpow2.f32 %v633_v26 }
 0x273   :  { %v1676_v28 = vpop.eup %1675 }
 0x274   :  { %v637_v30 = vmul.f32 %v1676_v28, %v635_v27 }
 0x275   :  { %v1678_v31 = vpop.eup %1677 }
 0x276   :  { %v638_v32 = vmul.f32 %v1678_v31, %v636_v29  ;;  %v639_v33 = vadd.f32 %v637_v30, %v621_v16 }
 0x278   :  { %v640_v34 = vadd.f32 %v638_v32, %v625_v20 }
 0x27a   :  { %v641_v36 = vpack.c.bf16 %v640_v34, %v639_v33 }
 0x27c   :  { %783 = vmatmul.mubr.bf16.vlgmr.msra.gmra.mrb[4].mxu0 %v641_v36 }
 0x27d   :  { %1452 = vmatpush3.bf16.msra.mxu0 %v1639_v35 }
 0x27e   :  { %1453 = vmatprep.subr.bf16.mxu0 %v1643_v37 }
 0x281   :  { %1454 = vmatpush3.bf16.msra.mxu0 %v1644_v38 }
 0x282   :  { %1455 = vmatprep.subr.bf16.mxu0 %v1648_v39 }
 0x285   :  { %1456 = vmatpush3.bf16.msra.mxu0 %v1649_v40 }
 0x286   :  { %1457 = vmatprep.subr.bf16.mxu0 %v1653_v41 }
 0x289   :  { %1458 = vmatpush3.bf16.msra.mxu0 %v1654_v42 }
 0x28a   :  { %1459 = vmatprep.subr.bf16.mxu0 %v1658_v43 }
 0x28d   :  { %1460 = vmatpush3.bf16.msra.mxu0 %v1659_v44 }
 0x28e   :  { %1461 = vmatprep.subr.bf16.mxu0 %v1663_v45 }
 0x291   :  { %1462 = vmatpush3.bf16.msra.mxu0 %v1664_v46 }
 0x292   :  { %1463 = vmatprep.subr.bf16.mxu0 %v1668_v48 }
 0x295   :  { %1464 = vmatpush3.bf16.msra.mxu0 %v1669_v50 }
 0x296   :  { %1465 = vmatprep.subr.bf16.mxu0 %v1673_v52 }
 0x299   :  { %1466 = vmatpush3.bf16.msra.mxu0 %v1674_v54 }
 0x34f   :  { %v784_v58 = vpop.f32.mrb[4].mxu0 }
 0x350   :  { %v785_v59 = vadd.f32 %v784_v58, %v663_v56  ;;  %v786_v60 = vpop.f32.mrb[5].mxu0 }
 0x351   :  { %v787_v61 = vadd.f32 %v786_v60, %v667_v57  ;;  %v788_v62 = vpop.f32.mrb[6].mxu0 }
 0x352   :  { %v789_v63 = vadd.f32 %v788_v62, %v663_v56  ;;  %v790_v0 = vpop.f32.mrb[7].mxu0  ;;  %v793_v2 = vmax.f32 %v785_v59, 0.0 }
 0x353   :  { %v791_v1 = vadd.f32 %v790_v0, %v667_v57  ;;  %v794_v4 = vmax.f32 %v787_v61, 0.0 }
 0x354   :  { %v795_v3 = vmax.f32 %v789_v63, 0.0 }
 0x355   :  { %v796_v5 = vmax.f32 %v791_v1, 0.0 }
 0x356   :  { %v797_v6 = vpack.c.bf16 %v795_v3, %v793_v2 }
 0x357   :  { %v798_v7 = vpack.c.bf16 %v796_v5, %v794_v4 }
 0x359   :  { %1168 = vmatprep.mubr.bf16.mxu1 %v798_v7  ;;  %1211 = vmatprep.mubr.bf16.mxu0 %v798_v7 }
 0x35a   :  { %1169 = vmatmul.mubr.bf16.vlgmr.msra.gmra.mrb[4].mxu1 %v797_v6  ;;  %1212 = vmatmul.mubr.bf16.vlgmr.msra.gmra.mrb[8].mxu0 %v797_v6 }
 0x35b   :  { %1846 = shalt.err (!%p1843_p10)
}
 0x35c   :  { %s1847_s30 = scalar_lea.hbm %s2162_s11, 256 }
 0x35d   :  { %p1848_p11 = scmp.ne.s32.totalorder %s2162_s11, %s1847_s30  ;;  %p1851_p12 = scmp.lt.u32.totalorder %s1847_s30, %s2162_s11 }
 0x35f   :  { %p1853_p13 = pnand %p1851_p12, %p1848_p11 }
 0x361   :  { %1856 = shalt.err (!%p1853_p13)
}
 0x362   :  { %1289 = dma.vmem_to_hbm [thread:$0]  %s1284_s1, 256, %s2162_s11, [#allocation15], %s1914_s13, %s1914_s13, %s1915_s14  }
 0x363   :  { %s1927_s20 = smov [#allocation16]  }
 0x364   :  { %s1295_s23 = sshll.u32 %s1927_s20, 4  ;;  %s1296_s23 = int_to_ptr.vmem [resolvable:$true] %s1295_s23 }
 0x365   :  { %s1857_s24 = scalar_lea.vmem %s1296_s23, 256  ;;  %p1862_p1 = scmp.lt.s32.totalorder %s1296_s23, %s1296_s23 }
 0x366   :  { %p1858_p0 = scmp.ne.s32.totalorder %s1296_s23, %s1857_s24  ;;  %p1863_p2 = scmp.lt.s32.totalorder %s1857_s24, %s1857_s24 }
 0x368   :  { %p1864_p3 = por %p1863_p2, %p1862_p1 }
 0x36a   :  { %p1865_p4 = pnand %p1864_p3, %p1858_p0 }
 0x36c   :  { %1868 = shalt.err (!%p1865_p4)
}
 0x36d   :  { %s1869_s4 = scalar_lea.hbm %s2163_s12, 256 }
 0x36e   :  { %p1870_p5 = scmp.ne.s32.totalorder %s2163_s12, %s1869_s4  ;;  %p1873_p6 = scmp.lt.u32.totalorder %s1869_s4, %s2163_s12 }
 0x370   :  { %p1875_p7 = pnand %p1873_p6, %p1870_p5 }
 0x372   :  { %1878 = shalt.err (!%p1875_p7)
}
 0x373   :  { %1301 = dma.vmem_to_hbm [thread:$0]  %s1296_s23, 256, %s2163_s12, [#allocation15], %s1914_s13, %s1914_s13, %s1915_s14   ;;  %v875_v9 = vsub.s32 2, %v2080_v11 }
 0x374   :  { %v863_v8 = vld [vmem:[%s2160_s9] sm:$0x7]  ;;  %s1928_s9 = smov [#allocation13]  }
 0x375   :  { %v868_v10 = vrot.slane %v863_v8, %v2083_v12  ;;  %v872_v13 = vrot.slane %v863_v8, %v2089_v14  ;;  %v876_v17 = vrot.slane %v863_v8, %v875_v9  ;;  %s1271_s12 = sshll.u32 %s1928_s9, 4  ;;  %s1272_s12 = int_to_ptr.vmem [resolvable:$true] %s1271_s12 }
 0x376   :  { %s1879_s13 = scalar_lea.vmem %s1272_s12, 768  ;;  %p1884_p9 = scmp.lt.s32.totalorder %s1272_s12, %s1272_s12 }
 0x377   :  { %p1880_p8 = scmp.ne.s32.totalorder %s1272_s12, %s1879_s13  ;;  %p1885_p10 = scmp.lt.s32.totalorder %s1879_s13, %s1879_s13 }
 0x379   :  { %p1886_p11 = por %p1885_p10, %p1884_p9 }
 0x37b   :  { %p1887_p12 = pnand %p1886_p11, %p1880_p8 }
 0x42d   :  { %v1170_v15 = vpop.f32.mrb[4].mxu1  ;;  %v1467_v16 = vpop.f32.mrb[8].mxu0 }
 0x42e   :  { %v1171_v18 = vadd.f32 %v1170_v15, %v868_v10  ;;  %v1172_v19 = vpop.f32.mrb[5].mxu1  ;;  %v1468_v20 = vpop.f32.mrb[9].mxu0 }
 0x42f   :  { %v1173_v21 = vadd.f32 %v1172_v19, %v872_v13  ;;  %v1469_v22 = vadd.f32 %v1468_v20, %v1467_v16  ;;  %v1174_v23 = vpop.f32.mrb[6].mxu1  ;;  %v1470_v24 = vpop.f32.mrb[10].mxu0 }
 0x430   :  { %v1445_v25 = vmul.f32 -1.442695, %v1171_v18  ;;  %v1175_v26 = vadd.f32 %v1174_v23, %v868_v10  ;;  %v1176_v27 = vpop.f32.mrb[7].mxu1  ;;  %v1471_v28 = vpop.f32.mrb[11].mxu0 }
 0x431   :  { %v1446_v29 = vmul.f32 -1.442695, %v1173_v21  ;;  %v1214_v11 = vadd.f32 %v1469_v22, %v876_v17  ;;  %v1177_v30 = vadd.f32 %v1176_v27, %v872_v13  ;;  %v1472_v12 = vadd.f32 %v1471_v28, %v1470_v24 }
 0x432   :  { %1679 = vpow2.f32 %v1445_v25  ;;  %v1448_v14 = vmul.f32 -1.442695, %v1175_v26 }
 0x433   :  { %1681 = vpow2.f32 %v1446_v29  ;;  %v1447_v31 = vmul.f32 -1.442695, %v1214_v11  ;;  %v1449_v32 = vmul.f32 -1.442695, %v1177_v30  ;;  %v1217_v33 = vadd.f32 %v1472_v12, %v876_v17 }
 0x434   :  { %1683 = vpow2.f32 %v1448_v14 }
 0x435   :  { %1685 = vpow2.f32 %v1447_v31  ;;  %v1450_v34 = vmul.f32 -1.442695, %v1217_v33 }
 0x436   :  { %1687 = vpow2.f32 %v1449_v32 }
 0x437   :  { %1689 = vpow2.f32 %v1450_v34 }
 0x43c   :  { %v1680_v35 = vpop.eup %1679 }
 0x43d   :  { %v1682_v36 = vpop.eup %1681  ;;  %v1238_v37 = vadd.f32 1.0, %v1680_v35 }
 0x43e   :  { %v1684_v38 = vpop.eup %1683  ;;  %v1239_v39 = vadd.f32 1.0, %v1682_v36 }
 0x43f   :  { %v1686_v40 = vpop.eup %1685  ;;  %1691 = vrcp.f32 %v1238_v37  ;;  %v1241_v41 = vadd.f32 1.0, %v1684_v38 }
 0x440   :  { %v1688_v42 = vpop.eup %1687  ;;  %1693 = vrcp.f32 %v1239_v39  ;;  %v1240_v43 = vadd.f32 1.0, %v1686_v40 }
 0x441   :  { %v1690_v44 = vpop.eup %1689  ;;  %1695 = vrcp.f32 %v1241_v41  ;;  %v1242_v45 = vadd.f32 1.0, %v1688_v42 }
 0x442   :  { %1697 = vrcp.f32 %v1240_v43  ;;  %v1243_v46 = vadd.f32 1.0, %v1690_v44 }
 0x443   :  { %1699 = vrcp.f32 %v1242_v45 }
 0x444   :  { %1701 = vrcp.f32 %v1243_v46 }
 0x449   :  { %v1692_v47 = vpop.eup %1691 }
 0x44a   :  { %v1694_v48 = vpop.eup %1693  ;;  %1256 = vst [vmem:[#allocation13] sm:$0xff] %v1692_v47 }
 0x44b   :  { %v1696_v49 = vpop.eup %1695  ;;  %1257 = vst [vmem:[#allocation13 + $0x8] sm:$0xff] %v1694_v48 }
 0x44c   :  { %v1698_v50 = vpop.eup %1697  ;;  %1259 = vst [vmem:[#allocation13 + $0x18] sm:$0xff] %v1696_v49 }
 0x44d   :  { %v1700_v51 = vpop.eup %1699  ;;  %1258 = vst [vmem:[#allocation13 + $0x10] sm:$0xff] %v1698_v50 }
 0x44e   :  { %v1702_v52 = vpop.eup %1701  ;;  %1260 = vst [vmem:[#allocation13 + $0x20] sm:$0xff] %v1700_v51 }
 0x44f   :  { %1261 = vst [vmem:[#allocation13 + $0x28] sm:$0xff] %v1702_v52 }
 0x450   :  { %1890 = shalt.err (!%p1887_p12)
}
 0x451   :  { %s1891_s1 = scalar_lea.hbm %s2161_s10, 768 }
 0x452   :  { %p1892_p13 = scmp.ne.s32.totalorder %s2161_s10, %s1891_s1  ;;  %p1895_p0 = scmp.lt.u32.totalorder %s1891_s1, %s2161_s10 }
 0x454   :  { %p1897_p1 = pnand %p1895_p0, %p1892_p13 }
 0x456   :  { %1900 = shalt.err (!%p1897_p1)
}
 0x457   :  { %s1929_s15 = smov 384   ;;  %s1930_s16 = smov 24  }
 0x458   :  { %1277 = dma.vmem_to_hbm [thread:$0]  %s1272_s12, 768, %s2161_s10, [#allocation4], %s1929_s15, %s1929_s15, %s1930_s16  }
 0x459   :  { %1909 = dma.done.wait [#allocation4], 768  }
 0x45a   :  { %1910 = vsyncadd [#allocation4], 4294966528 }
 0x45b   :  { %1911 = dma.done.wait [#allocation15], 512  }
 0x45c   :  { %1912 = vsyncadd [#allocation15], 4294966784 }
 0x45d   :  { %1311 = vsyncpa [#allocation3], 1 }
 0x45e   :  { %1312 = vsyncpa [#allocation6], 1 }
 0x45f   :  { %1313 = vsyncpa [#allocation9], 1 }
 0x460   :  { %1314 = vsyncpa [#allocation12], 1 }
 0x461   :  { %1315 = vsyncpa [#allocation4], 1 }
 0x462   :  { %1316 = vsyncpa [#allocation15], 1 }

</bundles_post_ra>
